<compile_context>
chip_gen: v7x
topology: tpu7x:2x2x1
jax: 0.10.0
libtpu: 0.0.40
codegen_flags: <defaults>
</compile_context>

<pallas_src>
import jax
import jax.numpy as jnp
from jax.experimental import pallas as pl
from jax.experimental.pallas import tpu as pltpu


def _round_up(n: int, m: int) -> int:
    return ((n + m - 1) // m) * m


def _pad2(a, rows, cols):
    r, c = a.shape
    return jnp.pad(a, ((0, rows - r), (0, cols - c)))


def _mlp_kernel(x_ref, w1_ref, b1_ref, w2_ref, b2_ref, wy_ref, by_ref, y_ref):
    """Whole forward pass for one batch tile, fully inside VMEM.

    x/w refs are bf16 (native MXU path); accumulation, bias add and tanh are
    f32 via preferred_element_type; output is stored f32."""
    x = x_ref[...]                                   # bf16 (tile, D_in_p)
    # hidden layer 1: Linear + tanh
    z1 = jnp.dot(x, w1_ref[...], preferred_element_type=jnp.float32) + b1_ref[...]
    h1 = jnp.tanh(z1).astype(jnp.bfloat16)
    # hidden layer 2: Linear + tanh
    z2 = jnp.dot(h1, w2_ref[...], preferred_element_type=jnp.float32) + b2_ref[...]
    h2 = jnp.tanh(z2).astype(jnp.bfloat16)
    # output layer: Linear + tanh (y_type == 'world')
    zy = jnp.dot(h2, wy_ref[...], preferred_element_type=jnp.float32) + by_ref[...]
    y_ref[...] = jnp.tanh(zy)


def network_forward(x, params, *, batch_tile=None, max_batch_tile=2048):
    """x: (B, input_size) float32.  params: dict of (in, out) weights + (1, out) biases."""
    w1, b1, w2, b2, wy, by = (params["w1"], params["b1"], params["w2"],
                              params["b2"], params["wy"], params["by"])
    B, D_in = x.shape
    H1 = w1.shape[1]
    H2 = w2.shape[1]
    D_out = wy.shape[1]

    # --- lane-pad feature dims to the next multiple of 128 (no over-padding) ---
    D_in_p = _round_up(D_in, 128)
    H1_p = _round_up(H1, 128)
    H2_p = _round_up(H2, 128)
    D_out_p = _round_up(D_out, 128)

    # --- batch tile: 128-aligned, aim for >= 4 grid steps, cap for VMEM ---
    B128 = _round_up(B, 128)
    if batch_tile is None:
        batch_tile = min(max_batch_tile,
                         max(128, _round_up(pl.cdiv(B128, 4), 128)))
    else:
        batch_tile = _round_up(batch_tile, 128)
    batch_tile = min(batch_tile, B128)
    B_p = _round_up(B, batch_tile)

    # --- pad + cast MXU operands to bf16 (biases / output stay f32) ---
    x_p = jnp.pad(x, ((0, B_p - B), (0, D_in_p - D_in))).astype(jnp.bfloat16)
    w1_p = _pad2(w1, D_in_p, H1_p).astype(jnp.bfloat16)
    w2_p = _pad2(w2, H1_p, H2_p).astype(jnp.bfloat16)
    wy_p = _pad2(wy, H2_p, D_out_p).astype(jnp.bfloat16)
    b1_p = _pad2(b1, 1, H1_p)
    b2_p = _pad2(b2, 1, H2_p)
    by_p = _pad2(by, 1, D_out_p)

    grid = (B_p // batch_tile,)

    cost = pl.CostEstimate(
        flops=2 * B_p * (D_in_p * H1_p + H1_p * H2_p + H2_p * D_out_p),
        transcendentals=B_p * (H1_p + H2_p + D_out_p),
        bytes_accessed=(2 * B_p * D_in_p                    # x (bf16)
                        + 4 * B_p * D_out_p                 # y (f32)
                        + 2 * (D_in_p * H1_p + H1_p * H2_p + H2_p * D_out_p)
                        + 4 * (H1_p + H2_p + D_out_p)),     # biases (f32)
    )

    # weights/biases are tiny -> constant block index on every grid step
    # (pipeliner keeps a single resident copy; no re-DMA after step 0)
    def rep(shape):
        return pl.BlockSpec(shape, lambda i: tuple(0 for _ in shape))

    y_p = pl.pallas_call(
        _mlp_kernel,
        out_shape=jax.ShapeDtypeStruct((B_p, D_out_p), jnp.float32),
        grid_spec=pltpu.PrefetchScalarGridSpec(
            num_scalar_prefetch=0,
            grid=grid,
            in_specs=[
                pl.BlockSpec((batch_tile, D_in_p), lambda i: (i, 0)),  # x tile
                rep((D_in_p, H1_p)),    # w1
                rep((1, H1_p)),         # b1
                rep((H1_p, H2_p)),      # w2
                rep((1, H2_p)),         # b2
                rep((H2_p, D_out_p)),   # wy
                rep((1, D_out_p)),      # by
            ],
            out_specs=pl.BlockSpec((batch_tile, D_out_p), lambda i: (i, 0)),
        ),
        compiler_params=pltpu.CompilerParams(
            dimension_semantics=("parallel",)),
        cost_estimate=cost,
    )(x_p, w1_p, b1_p, w2_p, b2_p, wy_p, by_p)

    # strip batch/feature padding
    return y_p[:B, :D_out]


def init_params(key, input_size, hidden_sizes, output_size, weight_init):
    """Mimics torch init: weights ~ U(-weight_init, weight_init), biases zero.

    Weights are stored already transposed to (in, out)."""
    sizes = [input_size] + list(hidden_sizes)
    keys = jax.random.split(key, len(hidden_sizes) + 1)
    params = {}
    for idx, (d_in, d_out) in enumerate(zip(sizes[:-1], sizes[1:]), start=1):
        w = jax.random.uniform(keys[idx - 1], (d_in, d_out),
                               minval=-weight_init, maxval=weight_init,
                               dtype=jnp.float32)
        params[f"w{idx}"] = w
        params[f"b{idx}"] = jnp.zeros((1, d_out), jnp.float32)
    wy = jax.random.uniform(keys[-1], (sizes[-1], output_size),
                            minval=-weight_init, maxval=weight_init,
                            dtype=jnp.float32)
    params["wy"] = wy
    params["by"] = jnp.zeros((1, output_size), jnp.float32)
    return params


def reference_forward(x, params):
    """Pure-JAX f32 reference matching the PyTorch forward semantics."""
    h = jnp.tanh(x @ params["w1"] + params["b1"])
    h = jnp.tanh(h @ params["w2"] + params["b2"])
    return jnp.tanh(h @ params["wy"] + params["by"])


# TODO(synk): compute_hs (offline-analysis helper returning all hidden states)
# is not implemented as a kernel; only the forward pass is.

if __name__ == "__main__":
    # calc_world_vector_size(add_grayscale=False) ~ n_colors * H * W;
    # consistent synthetic value: 3 * 8 * 8 = 192.
    INPUT_SIZE = 192
    OUTPUT_SIZE = 192        # y_type == 'world'
    HIDDEN_SIZES = (32, 32)  # params.hidden_sizes
    WEIGHT_INIT = 0.01       # params.weight_init
    BATCH = 256              # small demo batch -> auto tile 128, grid=(2,)

    key = jax.random.PRNGKey(0)
    k_x, k_p = jax.random.split(key)
    x = jax.random.uniform(k_x, (BATCH, INPUT_SIZE), dtype=jnp.float32)
    params = init_params(k_p, INPUT_SIZE, HIDDEN_SIZES, OUTPUT_SIZE, WEIGHT_INIT)

    y = network_forward(x, params)
    y = jax.block_until_ready(y)

    y_ref = reference_forward(x, params)
    assert y.shape == (BATCH, OUTPUT_SIZE)
    # bf16 MXU operands -> relaxed tolerance vs. the f32 reference
    assert jnp.allclose(y, y_ref, atol=2e-2, rtol=2e-2)

    print("KERNEL_OK")
</pallas_src>

<mosaic_0001>
module attributes {stable_mosaic.version = 11 : i64} {
  func.func @_mlp_kernel(%arg0: i32, %arg1: memref<128x256xbf16, #tpu.memory_space<vmem>>, %arg2: memref<256x128xbf16, #tpu.memory_space<vmem>>, %arg3: memref<1x128xf32, #tpu.memory_space<vmem>>, %arg4: memref<128x128xbf16, #tpu.memory_space<vmem>>, %arg5: memref<1x128xf32, #tpu.memory_space<vmem>>, %arg6: memref<128x256xbf16, #tpu.memory_space<vmem>>, %arg7: memref<1x256xf32, #tpu.memory_space<vmem>>, %arg8: memref<128x256xf32, #tpu.memory_space<vmem>>) attributes {dimension_semantics = [#tpu.dimension_semantics<parallel>], iteration_bounds = array<i64: 2>, scalar_prefetch = 0 : i64, scratch_operands = 0 : i64, tpu.core_type = #tpu.core_type<tc>, window_params = [{transform_indices = @transform_0, window_bounds = array<i64: 128, 256>}, {pipeline_mode = #tpu.pipeline_mode<synchronous>, transform_indices = @transform_1, window_bounds = array<i64: 256, 128>}, {pipeline_mode = #tpu.pipeline_mode<synchronous>, transform_indices = @transform_2, window_bounds = array<i64: 1, 128>}, {pipeline_mode = #tpu.pipeline_mode<synchronous>, transform_indices = @transform_3, window_bounds = array<i64: 128, 128>}, {pipeline_mode = #tpu.pipeline_mode<synchronous>, transform_indices = @transform_4, window_bounds = array<i64: 1, 128>}, {pipeline_mode = #tpu.pipeline_mode<synchronous>, transform_indices = @transform_5, window_bounds = array<i64: 128, 256>}, {pipeline_mode = #tpu.pipeline_mode<synchronous>, transform_indices = @transform_6, window_bounds = array<i64: 1, 256>}, {transform_indices = @transform_7, window_bounds = array<i64: 128, 256>}]} {
    %c0 = arith.constant 0 : index
    %c0_0 = arith.constant 0 : index
    %0 = vector.load %arg1[%c0, %c0_0] : memref<128x256xbf16, #tpu.memory_space<vmem>>, vector<128x256xbf16>
    %c0_1 = arith.constant 0 : index
    %c0_2 = arith.constant 0 : index
    %1 = vector.load %arg2[%c0_1, %c0_2] : memref<256x128xbf16, #tpu.memory_space<vmem>>, vector<256x128xbf16>
    %cst = arith.constant dense<0.000000e+00> : vector<128x128xf32>
    %2 = tpu.matmul %0, %1, %cst {dimension_numbers = #tpu.dot_dimension_numbers<[1], [0], [0], [1], [0, 0, 1, 1], [], []>} : vector<128x256xbf16>, vector<256x128xbf16>, vector<128x128xf32> -> vector<128x128xf32>
    %c0_3 = arith.constant 0 : index
    %c0_4 = arith.constant 0 : index
    %3 = vector.load %arg3[%c0_3, %c0_4] : memref<1x128xf32, #tpu.memory_space<vmem>>, vector<1x128xf32>
    %4 = vector.broadcast %3 : vector<1x128xf32> to vector<128x128xf32>
    %5 = arith.addf %2, %4 : vector<128x128xf32>
    %6 = math.tanh %5 : vector<128x128xf32>
    %7 = arith.truncf %6 : vector<128x128xf32> to vector<128x128xbf16>
    %c0_5 = arith.constant 0 : index
    %c0_6 = arith.constant 0 : index
    %8 = vector.load %arg4[%c0_5, %c0_6] : memref<128x128xbf16, #tpu.memory_space<vmem>>, vector<128x128xbf16>
    %cst_7 = arith.constant dense<0.000000e+00> : vector<128x128xf32>
    %9 = tpu.matmul %7, %8, %cst_7 {dimension_numbers = #tpu.dot_dimension_numbers<[1], [0], [0], [1], [0, 0, 1, 1], [], []>} : vector<128x128xbf16>, vector<128x128xbf16>, vector<128x128xf32> -> vector<128x128xf32>
    %c0_8 = arith.constant 0 : index
    %c0_9 = arith.constant 0 : index
    %10 = vector.load %arg5[%c0_8, %c0_9] : memref<1x128xf32, #tpu.memory_space<vmem>>, vector<1x128xf32>
    %11 = vector.broadcast %10 : vector<1x128xf32> to vector<128x128xf32>
    %12 = arith.addf %9, %11 : vector<128x128xf32>
    %13 = math.tanh %12 : vector<128x128xf32>
    %14 = arith.truncf %13 : vector<128x128xf32> to vector<128x128xbf16>
    %c0_10 = arith.constant 0 : index
    %c0_11 = arith.constant 0 : index
    %15 = vector.load %arg6[%c0_10, %c0_11] : memref<128x256xbf16, #tpu.memory_space<vmem>>, vector<128x256xbf16>
    %cst_12 = arith.constant dense<0.000000e+00> : vector<128x256xf32>
    %16 = tpu.matmul %14, %15, %cst_12 {dimension_numbers = #tpu.dot_dimension_numbers<[1], [0], [0], [1], [0, 0, 1, 1], [], []>} : vector<128x128xbf16>, vector<128x256xbf16>, vector<128x256xf32> -> vector<128x256xf32>
    %c0_13 = arith.constant 0 : index
    %c0_14 = arith.constant 0 : index
    %17 = vector.load %arg7[%c0_13, %c0_14] : memref<1x256xf32, #tpu.memory_space<vmem>>, vector<1x256xf32>
    %18 = vector.broadcast %17 : vector<1x256xf32> to vector<128x256xf32>
    %19 = arith.addf %16, %18 : vector<128x256xf32>
    %20 = math.tanh %19 : vector<128x256xf32>
    %c0_15 = arith.constant 0 : index
    %c0_16 = arith.constant 0 : index
    %21 = vector.load %arg8[%c0_15, %c0_16] : memref<128x256xf32, #tpu.memory_space<vmem>>, vector<128x256xf32>
    tpu.vector_store %arg8[%c0_15, %c0_16], %20 {strides = array<i32>} : memref<128x256xf32, #tpu.memory_space<vmem>>, vector<128x256xf32>,
    return
  }
  func.func @transform_0(%arg0: i32) -> (i32, i32) {
    %c0_i32 = arith.constant 0 : i32
    %c0_i32_0 = arith.constant 0 : i32
    return %arg0, %c0_i32 : i32, i32
  }
  func.func @transform_1(%arg0: i32) -> (i32, i32) {
    %c0_i32 = arith.constant 0 : i32
    %c0_i32_0 = arith.constant 0 : i32
    %c0_i32_1 = arith.constant 0 : i32
    return %c0_i32, %c0_i32_0 : i32, i32
  }
  func.func @transform_2(%arg0: i32) -> (i32, i32) {
    %c0_i32 = arith.constant 0 : i32
    %c0_i32_0 = arith.constant 0 : i32
    %c0_i32_1 = arith.constant 0 : i32
    return %c0_i32, %c0_i32_0 : i32, i32
  }
  func.func @transform_3(%arg0: i32) -> (i32, i32) {
    %c0_i32 = arith.constant 0 : i32
    %c0_i32_0 = arith.constant 0 : i32
    %c0_i32_1 = arith.constant 0 : i32
    return %c0_i32, %c0_i32_0 : i32, i32
  }
  func.func @transform_4(%arg0: i32) -> (i32, i32) {
    %c0_i32 = arith.constant 0 : i32
    %c0_i32_0 = arith.constant 0 : i32
    %c0_i32_1 = arith.constant 0 : i32
    return %c0_i32, %c0_i32_0 : i32, i32
  }
  func.func @transform_5(%arg0: i32) -> (i32, i32) {
    %c0_i32 = arith.constant 0 : i32
    %c0_i32_0 = arith.constant 0 : i32
    %c0_i32_1 = arith.constant 0 : i32
    return %c0_i32, %c0_i32_0 : i32, i32
  }
  func.func @transform_6(%arg0: i32) -> (i32, i32) {
    %c0_i32 = arith.constant 0 : i32
    %c0_i32_0 = arith.constant 0 : i32
    %c0_i32_1 = arith.constant 0 : i32
    return %c0_i32, %c0_i32_0 : i32, i32
  }
  func.func @transform_7(%arg0: i32) -> (i32, i32) {
    %c0_i32 = arith.constant 0 : i32
    %c0_i32_0 = arith.constant 0 : i32
    return %arg0, %c0_i32 : i32, i32
  }
}

</mosaic_0001>

<bundles_post_ra>
// kernel: tpu_custom_call.1
= control target key start
LH: loop header
LB: loop body
LE: loop exit
PB: predicated region body
PF: predicated region fallthrough
CT: control target
= control target key end

     0   :  { %12 = vsyncpa [#allocation3], 0  ;;  %s2465_s0 = inlined_call_operand.hbm [shape: bf16[256,256], index: 0, kind: input, shape index: {}]   ;;  %s2466_s1 = inlined_call_operand.hbm [shape: bf16[256,128], index: 1, kind: input, shape index: {}]   ;;  %s2467_s2 = inlined_call_operand.vmem [shape: f32[1,128], index: 2, kind: input, shape index: {}]   ;;  %s2468_s3 = inlined_call_operand.hbm [shape: bf16[128,128], index: 3, kind: input, shape index: {}]   ;;  %s2469_s4 = inlined_call_operand.vmem [shape: f32[1,128], index: 4, kind: input, shape index: {}]   ;;  %s2470_s5 = inlined_call_operand.hbm [shape: bf16[128,256], index: 5, kind: input, shape index: {}]   ;;  %s2471_s6 = inlined_call_operand.vmem [shape: f32[1,256], index: 6, kind: input, shape index: {}]   ;;  %s2472_s7 = inlined_call_operand.hbm [shape: f32[256,256], index: 7, kind: output, shape index: {}]  }
   0x1   :  { %14 = vsyncpa [#allocation3 + $0x1], 0 }
   0x2   :  { %15 = vsyncpa [#allocation6], 0 }
   0x3   :  { %16 = vsyncpa [#allocation9], 0 }
   0x4   :  { %17 = vsyncpa [#allocation4], 0 }
   0x5   :  { %19 = vsyncpa [#allocation4 + $0x1], 0  ;;  %s2029_s24 = smov 0   ;;  %s2031_s25 = smov 0  }
   0x6   :  { %s2033_s26 = smov 0   ;;  %s2035_s27 = smov 0  }
   0x7 LB: > { %s2050_s28 = sadd.s32 4294967295, %s1975_s27   ;;  %s1291_s29 = sadd.s32 4294967294, %s1975_s27   ;;  %s1975_s27 = sphi %s2035_s27, %s2498_s27   ;;  %s1971_s26 = sphi %s2033_s26, %s2497_s26   ;;  %s1967_s25 = sphi %s2031_s25, %s2496_s25   ;;  %s1963_s24 = sphi %s2029_s24, %s2495_s24  }
   0x8   : > { %p45_p0 = scmp.ne.s32.totalorder %s1967_s25, %s1963_s24  ;;  %p2473_p1 = scmp.eq.s32.totalorder %s2050_s28, 0 }
   0x9   : > { %p201_p3 = scmp.eq.s32.totalorder %s1291_s29, 1  ;;  %p1292_p5 = scmp.ge.s32.totalorder %s1975_s27, 1 }
   0xa   : > { %p2059_p4 = por %p2473_p1, %p45_p0  ;;  %p208_p7 = scmp.lt.s32.totalorder %s1975_s27, 3 }
   0xb   : > { %p2064_p6 = por %p201_p3, %p45_p0  ;;  %s1977_s10 = smov [#allocation5]  }
   0xc   : > { %s2477_s30 = scalar_select %p2059_p4, 1, 0 }
   0xd   : > { %s2478_s8 = scalar_select %p2064_p6, 1, 0 }
   0xe   : > { %p2069_p8 = pnand %p1292_p5, %p208_p7  ;;  %s220_s11 = sshll.u32 %s1977_s10, 4  ;;  %s2073_s11 = int_to_ptr.vmem [resolvable:$true] %s220_s11 }
   0xf   : > { %2479 = sst [smem:[#allocation15_spill]] %s2478_s8  ;;  %s1978_s13 = smov [#allocation7]  }
  0x10   : > { %s2480_s9 = scalar_select %p2069_p8, 1, 0 }
  0x11   : > { %p1519_p9 = pneg %p2069_p8  ;;  %s236_s14 = sshll.u32 %s1978_s13, 4  ;;  %s2084_s14 = int_to_ptr.vmem [resolvable:$true] %s236_s14 }
  0x12   : > { %s1979_s15 = smov [#allocation8]   ;;  %s1787_s19 = scalar_lea.hbm %s2466_s1, 2048 }
  0x13   : > { %p2080_p11 = pnand %p1519_p9, %p2473_p1  ;;  %s2086_s16 = sshll.u32 %s1979_s15, 4  ;;  %s253_s16 = int_to_ptr.vmem [resolvable:$true] %s2086_s16 }
  0x14   : > { %p1788_p12 = scmp.ne.s32.totalorder %s2466_s1, %s1787_s19  ;;  %p1794_p5 = scmp.lt.u32.totalorder %s1787_s19, %s2466_s1 }
  0x15   : > { %p2096_p13 = pneg %p2080_p11 }
  0x17   : > { %p1790_p0 = pnand %p2096_p13, %p1788_p12 }
  0x19   : > { %p1791_p3 = pneg %p1790_p0 }
  0x1b   : > { %p1796_p7 = pnand %p1794_p5, %p1791_p3 }
  0x1d   : > { %1799 = shalt.err (!%p1796_p7)
}
  0x1e   : > { %s1800_s10 = scalar_lea.vmem %s2073_s11, 2048  ;;  %p1808_p2 = scmp.lt.s32.totalorder %s2073_s11, %s2073_s11 }
  0x1f   : > { %p1801_p9 = scmp.ne.s32.totalorder %s2073_s11, %s1800_s10  ;;  %p1809_p6 = scmp.lt.s32.totalorder %s1800_s10, %s1800_s10 }
  0x21   : > { %p1803_p10 = pnand %p1801_p9, %p2096_p13  ;;  %p1810_p12 = por %p1809_p6, %p1808_p2 }
  0x23   : > { %p1804_p1 = pneg %p1803_p10 }
  0x25   : > { %p1811_p0 = pnand %p1810_p12, %p1804_p1 }
  0x27   : > { %1814 = shalt.err (!%p1811_p0)
}
  0x28   : > { %s1980_s13 = smov 64   ;;  %s1981_s15 = smov 4  }
  0x29   : > { %1522 = dma.hbm_to_vmem [thread:$0]  (!%p2080_p11), %s2466_s1, 2048, %s2073_s11, [#allocation6], %s1980_s13, %s1980_s13, %s1981_s15  }
  0x2a   : > { %s1815_s21 = scalar_lea.hbm %s2468_s3, 1024 }
  0x2b   : > { %p1816_p2 = scmp.ne.s32.totalorder %s2468_s3, %s1815_s21  ;;  %p1822_p10 = scmp.lt.u32.totalorder %s1815_s21, %s2468_s3 }
  0x2d   : > { %p1818_p1 = pnand %p1816_p2, %p2096_p13 }
  0x2f   : > { %p1819_p6 = pneg %p1818_p1 }
  0x31   : > { %p1824_p3 = pnand %p1822_p10, %p1819_p6 }
  0x33   : > { %1827 = shalt.err (!%p1824_p3)
}
  0x34   : > { %s1828_s11 = scalar_lea.vmem %s2084_s14, 1024  ;;  %p1836_p12 = scmp.lt.s32.totalorder %s2084_s14, %s2084_s14 }
  0x35   : > { %p1829_p5 = scmp.ne.s32.totalorder %s2084_s14, %s1828_s11  ;;  %p1837_p0 = scmp.lt.s32.totalorder %s1828_s11, %s1828_s11 }
  0x37   : > { %p1831_p7 = pnand %p1829_p5, %p2096_p13  ;;  %p1838_p2 = por %p1837_p0, %p1836_p12 }
  0x39   : > { %p1832_p9 = pneg %p1831_p7 }
  0x3b   : > { %p1839_p1 = pnand %p1838_p2, %p1832_p9 }
  0x3d   : > { %1842 = shalt.err (!%p1839_p1)
}
  0x3e   : > { %1525 = dma.hbm_to_vmem [thread:$0]  (!%p2080_p11), %s2468_s3, 1024, %s2084_s14, [#allocation6], %s1980_s13, %s1980_s13, %s1981_s15  }
  0x3f   : > { %s1843_s20 = scalar_lea.hbm %s2470_s5, 2048 }
  0x40   : > { %p1844_p6 = scmp.ne.s32.totalorder %s2470_s5, %s1843_s20  ;;  %p1850_p5 = scmp.lt.u32.totalorder %s1843_s20, %s2470_s5 }
  0x42   : > { %p1846_p10 = pnand %p1844_p6, %p2096_p13 }
  0x44   : > { %p1847_p3 = pneg %p1846_p10 }
  0x46   : > { %p1852_p7 = pnand %p1850_p5, %p1847_p3 }
  0x48   : > { %1855 = shalt.err (!%p1852_p7)
}
  0x49   : > { %s1856_s11 = scalar_lea.vmem %s253_s16, 2048  ;;  %p1864_p2 = scmp.lt.s32.totalorder %s253_s16, %s253_s16 }
  0x4a   : > { %p1857_p9 = scmp.ne.s32.totalorder %s253_s16, %s1856_s11  ;;  %p1865_p1 = scmp.lt.s32.totalorder %s1856_s11, %s1856_s11 }
  0x4c   : > { %p1859_p12 = pnand %p1857_p9, %p2096_p13  ;;  %p1866_p4 = por %p1865_p1, %p1864_p2 }
  0x4e   : > { %p1860_p0 = pneg %p1859_p12 }
  0x50   : > { %p1867_p8 = pnand %p1866_p4, %p1860_p0 }
  0x52   : > { %1870 = shalt.err (!%p1867_p8)
}
  0x53   : > { %s1982_s14 = smov 128   ;;  %s1983_s22 = smov 8  }
  0x54   : > { %1528 = dma.hbm_to_vmem [thread:$0]  (!%p2080_p11), %s2470_s5, 2048, %s253_s16, [#allocation9], %s1982_s14, %s1982_s14, %s1983_s22  }
  0x55   : > { %s2163_s8 = sadd.s32 1, %s1975_s27   ;;  %s32_s18 = sadd.s32 1, %s1971_s26 }
  0x56   : > { %s29_s17 = ssub.s32 %s1975_s27, %s2163_s8  ;;  %p39_p8 = scmp.ne.s32.totalorder %s1971_s26, %s1967_s25 }
  0x57   : > { %p30_p4 = scmp.eq.s32.totalorder %s29_s17, 0  ;;  %p40_p13 = scmp.eq.s32.totalorder %s1975_s27, 0 }
  0x58   : > { %p1540_p6 = scmp.lt.s32.totalorder %s1975_s27, 2  ;;  %p2483_p3 = scmp.eq.s32.totalorder %s2050_s28, 1 }
  0x59   : > { %s2173_s19 = scalar_select %p30_p4, %s1971_s26, %s32_s18  }
  0x5a   : > { %p41_p10 = por %p40_p13, %p39_p8  ;;  %p2177_p5 = por %p2483_p3, %p39_p8 }
  0x5b   : > { %s269_s20 = sand.u32 1, %s1971_s26   ;;  %s1372_s21 = sshll.u32 %s1975_s27, 11 }
  0x5c   : > { %s1297_s16 = sshll.u32 %s269_s20, 7  ;;  %s2186_s10 = scalar_lea.hbm %s2465_s0, %s1372_s21 }
  0x5d   : > { %s273_s11 = scalar_lea.vmem [#allocation2], %s1297_s16  ;;  %p2188_p11 = pnand %p1540_p6, %p41_p10 }
  0x5e   : > { %s281_s13 = sshll.u32 %s273_s11, 4  ;;  %s2194_s17 = scalar_lea.sflag [#allocation3], %s269_s20  ;;  %s2192_s13 = int_to_ptr.vmem [resolvable:$true] %s281_s13 }
  0x5f   : > { %s1871_s18 = scalar_lea.hbm %s2186_s10, 2048  ;;  %p1873_p9 = pneg %p2188_p11 }
  0x60   : > { %p1872_p7 = scmp.ne.s32.totalorder %s2186_s10, %s1871_s18  ;;  %s1876_s23 = scalar_lea.hbm %s2465_s0, 4096 }
  0x61   : > { %p1877_p2 = scmp.lt.u32.totalorder %s2186_s10, %s2465_s0  ;;  %p1878_p1 = scmp.lt.u32.totalorder %s1876_s23, %s1871_s18 }
  0x62   : > { %p1874_p12 = pnand %p1873_p9, %p1872_p7  ;;  %p1880_p8 = scmp.lt.u32.totalorder %s1871_s18, %s2186_s10 }
  0x63   : > { %p1879_p4 = por %p1878_p1, %p1877_p2 }
  0x64   : > { %p1875_p0 = pneg %p1874_p12 }
  0x65   : > { %p1881_p13 = por %p1880_p8, %p1879_p4 }
  0x67   : > { %p1882_p6 = pnand %p1881_p13, %p1875_p0 }
  0x69   : > { %1885 = shalt.err (!%p1882_p6)
}
  0x6a   : > { %s1886_s20 = scalar_lea.vmem %s2192_s13, 2048  ;;  %s1984_s21 = smov [#allocation2]  }
  0x6b   : > { %p1887_p10 = scmp.ne.s32.totalorder %s2192_s13, %s1886_s20  ;;  %s1891_s16 = sshll.u32 %s1984_s21, 4  ;;  %s1892_s16 = int_to_ptr.vmem [resolvable:$false] %s1891_s16 }
  0x6c   : > { %s1893_s29 = scalar_lea.vmem %s1892_s16, 4096  ;;  %p1894_p12 = scmp.lt.s32.totalorder %s2192_s13, %s1892_s16 }
  0x6d   : > { %p1889_p3 = pnand %p1887_p10, %p1873_p9  ;;  %p1895_p2 = scmp.lt.s32.totalorder %s1893_s29, %s1886_s20 }
  0x6f   : > { %p1890_p7 = pneg %p1889_p3  ;;  %p1896_p1 = por %p1895_p2, %p1894_p12 }
  0x71   : > { %p1897_p4 = pnand %p1896_p1, %p1890_p7 }
  0x73   : > { %1900 = shalt.err (!%p1897_p4)
}
  0x74   : > { %1532 = dma.hbm_to_vmem [thread:$0]  (!%p2188_p11), %s2186_s10, 2048, %s2192_s13, %s2194_s17, %s1982_s14, %s1982_s14, %s1983_s22  }
  0x75   : > { %p2486_p9 = scmp.ne.s32.totalorder %s2480_s9, 0 }
  0x76   : > { %s2228_s18 = sand.u32 (!%p2486_p9), 1, %s1967_s25   ;;  %p2487_p0 = scmp.ne.s32.totalorder (!%p2486_p9), %s2477_s30, 0 }
  0x77   : > { %293 = sbr.rel (%p2486_p9) target bundleno = 936 (0x3a8), region = 48  ;;  %s1302_s23 = sshll.u32 (!%p2486_p9), %s2228_s18, 7 }
  0x78   : > { %s296_s11 = scalar_lea.sflag (!%p2486_p9), [#allocation3], %s2228_s18  ;;  %s2232_s20 = scalar_lea.vmem (!%p2486_p9), [#allocation2], %s1302_s23 }
  0x7e   : > { %1946 = dma.done.wait (%p2487_p0), %s296_s11, 2048  }
  0x7f   : > { %1948 = vsyncadd (%p2487_p0), %s296_s11, 4294965248  ;;  %p2488_p11 = scmp.eq.s32.totalorder %s2050_s28, 0 }
  0x81   : > { %1950 = dma.done.wait (%p2488_p11), [#allocation6], 3072   ;;  %p2489_p8 = pmov %p2488_p11 }
  0x83   : > { %1952 = vsyncadd (%p2489_p8), [#allocation6], 4294964224  ;;  %p2490_p13 = pmov %p2489_p8 }
  0x84   : > { %p2491_p6 = pmov %p2489_p8 }
  0x85   : > { %1954 = dma.done.wait (%p2490_p13), [#allocation9], 2048  }
  0x86   : > { %1956 = vsyncadd (%p2491_p6), [#allocation9], 4294965248  ;;  %v1587_v0 = vld [vmem:[#allocation5 + $0x40] sm:$0xff]   ;;  %v1589_v2 = vld [vmem:[#allocation5 + $0x48] sm:$0xff]   ;;  %s1306_s15 = sshll.u32 %s2228_s18, 8  ;;  %s1374_s21 = sshll.u32 %s2050_s28, 12 }
  0x87   : > { %v1588_v1 = vld [vmem:[#allocation5] sm:$0xff]   ;;  %1375 = vmatprep.subr.bf16.mxu0 %v1587_v0  ;;  %v1590_v3 = vld [vmem:[#allocation5 + $0x8] sm:$0xff]   ;;  %v1591_v4 = vld [vmem:[#allocation5 + $0x50] sm:$0xff]   ;;  %s2356_s17 = scalar_lea.vmem [#allocation10], %s1306_s15  ;;  %s2416_s11 = scalar_lea.hbm %s2472_s7, %s1374_s21 }
  0x88   : > { %1376 = vmatpush3.bf16.msra.mxu0 %v1588_v1  ;;  %v1592_v5 = vld [vmem:[#allocation5 + $0x10] sm:$0xff]   ;;  %v1593_v6 = vld [vmem:[#allocation5 + $0x58] sm:$0xff]   ;;  %v1595_v8 = vld [vmem:[#allocation5 + $0x60] sm:$0xff]   ;;  %s1189_s16 = sshll.u32 %s2356_s17, 4  ;;  %s1175_s28 = scalar_lea.sflag [#allocation4], %s2228_s18  ;;  %s2418_s16 = int_to_ptr.vmem [resolvable:$true] %s1189_s16 }
  0x89   : > { %1377 = vmatprep.subr.bf16.mxu0 %v1589_v2  ;;  %v1594_v7 = vld [vmem:[#allocation5 + $0x18] sm:$0xff]   ;;  %v1596_v9 = vld [vmem:[#allocation5 + $0x20] sm:$0xff]   ;;  %v1597_v10 = vld [vmem:[#allocation5 + $0x68] sm:$0xff]   ;;  %s1986_s30 = smov [#allocation10]  }
  0x8a   : > { %v1605_v11 = vld [vmem:[%s2232_s20 + $0x4] ss:$8 sps:$4 sm:$0xff]   ;;  %v1599_v13 = vld [vmem:[#allocation5 + $0x70] sm:$0xff]   ;;  %v1601_v15 = vld [vmem:[#allocation5 + $0x78] sm:$0xff]   ;;  %s1905_s9 = sshll.u32 %s1986_s30, 4  ;;  %s1906_s9 = int_to_ptr.vmem [resolvable:$false] %s1905_s9 }
  0x8b   : > { %v1598_v12 = vld [vmem:[#allocation5 + $0x28] sm:$0xff]   ;;  %608 = vmatprep.mubr.bf16.mxu0 %v1605_v11  ;;  %v1600_v14 = vld [vmem:[#allocation5 + $0x30] sm:$0xff]   ;;  %v1602_v16 = vld [vmem:[#allocation5 + $0x38] sm:$0xff]   ;;  %s1907_s14 = scalar_lea.vmem %s1906_s9, 8192  ;;  %p1908_p12 = scmp.lt.s32.totalorder %s2418_s16, %s1906_s9 }
  0x8c   : > { %1378 = vmatpush3.bf16.msra.mxu0 %v1590_v3  ;;  %v1627_v17 = vld [vmem:[#allocation7] sm:$0xff]   ;;  %v1606_v19 = vld [vmem:[%s2232_s20 + $0x14] ss:$8 sps:$4 sm:$0xff]   ;;  %v1608_v20 = vld [vmem:[%s2232_s20 + $0x10] ss:$8 sps:$4 sm:$0xff]  }
  0x8d   : > { %1379 = vmatprep.subr.bf16.mxu0 %v1591_v4  ;;  %v1603_v18 = vld [vmem:[%s2232_s20] ss:$8 sps:$4 sm:$0xff]   ;;  %1455 = vmatprep.subr.bf16.mxu1 %v1627_v17  ;;  %v1609_v21 = vld [vmem:[%s2232_s20 + $0x24] ss:$8 sps:$4 sm:$0xff]   ;;  %v1612_v23 = vld [vmem:[%s2232_s20 + $0x34] ss:$8 sps:$4 sm:$0xff]  }
  0x8e   : > { %1456 = vmatpush3.bf16.msra.mxu1 %v1627_v17  ;;  %v1611_v22 = vld [vmem:[%s2232_s20 + $0x20] ss:$8 sps:$4 sm:$0xff]   ;;  %v1614_v24 = vld [vmem:[%s2232_s20 + $0x30] ss:$8 sps:$4 sm:$0xff]   ;;  %v1615_v25 = vld [vmem:[%s2232_s20 + $0x44] ss:$8 sps:$4 sm:$0xff]  }
  0x8f   : > { %v1617_v26 = vld [vmem:[%s2232_s20 + $0x40] ss:$8 sps:$4 sm:$0xff]   ;;  %v1618_v27 = vld [vmem:[%s2232_s20 + $0x54] ss:$8 sps:$4 sm:$0xff]   ;;  %v1620_v28 = vld [vmem:[%s2232_s20 + $0x50] ss:$8 sps:$4 sm:$0xff]  }
  0x90   : > { %1380 = vmatpush3.bf16.msra.mxu0 %v1592_v5  ;;  %v1621_v29 = vld [vmem:[%s2232_s20 + $0x64] ss:$8 sps:$4 sm:$0xff]   ;;  %v1623_v30 = vld [vmem:[%s2232_s20 + $0x60] ss:$8 sps:$4 sm:$0xff]   ;;  %v1624_v31 = vld [vmem:[%s2232_s20 + $0x74] ss:$8 sps:$4 sm:$0xff]  }
  0x91   : > { %1381 = vmatprep.subr.bf16.mxu0 %v1593_v6  ;;  %v1626_v32 = vld [vmem:[%s2232_s20 + $0x70] ss:$8 sps:$4 sm:$0xff]   ;;  %v1628_v33 = vld [vmem:[#allocation7 + $0x8] sm:$0xff]   ;;  %v1631_v36 = vld [vmem:[#allocation7 + $0x20] sm:$0xff]   ;;  %s1901_s20 = scalar_lea.vmem %s2418_s16, 4096 }
  0x92   : > { %1457 = vmatprep.subr.bf16.mxu1 %v1628_v33  ;;  %v1629_v34 = vld [vmem:[#allocation7 + $0x10] sm:$0xff]   ;;  %v1630_v35 = vld [vmem:[#allocation7 + $0x18] sm:$0xff]   ;;  %v1632_v37 = vld [vmem:[#allocation7 + $0x28] sm:$0xff]   ;;  %p1902_p10 = scmp.ne.s32.totalorder %s2418_s16, %s1901_s20  ;;  %p1909_p2 = scmp.lt.s32.totalorder %s1907_s14, %s1901_s20 }
  0x93   : > { %1458 = vmatpush3.bf16.msra.mxu1 %v1628_v33  ;;  %v1633_v38 = vld [vmem:[#allocation7 + $0x30] sm:$0xff]   ;;  %v1634_v39 = vld [vmem:[#allocation7 + $0x38] sm:$0xff]   ;;  %v2262_v40 = vld [vmem:[#allocation8] ss:$8 sps:$4 sm:$0xff]  }
  0x94   : > { %1382 = vmatpush3.bf16.msra.mxu0 %v1594_v7  ;;  %1459 = vmatprep.subr.bf16.mxu1 %v1629_v34  ;;  %v1637_v41 = vld [vmem:[#allocation8 + $0x4] ss:$8 sps:$4 sm:$0xff]   ;;  %v2264_v42 = vld [vmem:[#allocation8 + $0x14] ss:$8 sps:$4 sm:$0xff]   ;;  %v2267_v43 = vld [vmem:[#allocation8 + $0x10] ss:$8 sps:$4 sm:$0xff]   ;;  %p1903_p3 = pnand %p1902_p10, %p2177_p5  ;;  %p1910_p1 = por %p1909_p2, %p1908_p12 }
  0x95   : > { %1383 = vmatprep.subr.bf16.mxu0 %v1595_v8  ;;  %v2270_v44 = vld [vmem:[#allocation8 + $0x24] ss:$8 sps:$4 sm:$0xff]   ;;  %v2273_v45 = vld [vmem:[#allocation8 + $0x20] ss:$8 sps:$4 sm:$0xff]   ;;  %v2276_v46 = vld [vmem:[#allocation8 + $0x34] ss:$8 sps:$4 sm:$0xff]  }
  0x96   : > { %v2279_v47 = vld [vmem:[#allocation8 + $0x30] ss:$8 sps:$4 sm:$0xff]   ;;  %v2286_v49 = vld [vmem:[%s2467_s2] ss:$0 sm:$0xff]  ;;  %p1904_p7 = pneg %p1903_p3 }
  0x97   : > { %1460 = vmatpush3.bf16.msra.mxu1 %v1629_v34 }
  0x98   : > { %1384 = vmatpush3.bf16.msra.mxu0 %v1596_v9  ;;  %1461 = vmatprep.subr.bf16.mxu1 %v1630_v35  ;;  %p1911_p4 = pnand %p1910_p1, %p1904_p7 }
  0x99   : > { %1385 = vmatprep.subr.bf16.mxu0 %v1597_v10 }
  0x9b   : > { %1462 = vmatpush3.bf16.msra.mxu1 %v1630_v35 }
  0x9c   : > { %1386 = vmatpush3.bf16.msra.mxu0 %v1598_v12  ;;  %1463 = vmatprep.subr.bf16.mxu1 %v1631_v36 }
  0x9d   : > { %1387 = vmatprep.subr.bf16.mxu0 %v1599_v13 }
  0x9f   : > { %1464 = vmatpush3.bf16.msra.mxu1 %v1631_v36 }
  0xa0   : > { %1388 = vmatpush3.bf16.msra.mxu0 %v1600_v14  ;;  %1465 = vmatprep.subr.bf16.mxu1 %v1632_v37 }
  0xa1   : > { %1389 = vmatprep.subr.bf16.mxu0 %v1601_v15 }
  0xa3   : > { %1466 = vmatpush3.bf16.msra.mxu1 %v1632_v37 }
  0xa4   : > { %1390 = vmatpush3.bf16.msra.mxu0 %v1602_v16  ;;  %1467 = vmatprep.subr.bf16.mxu1 %v1633_v38 }
  0xa5   : > { %997 = vmatprep.subr.bf16.mxu0 %v1637_v41 }
  0xa7   : > { %609 = vmatmul.mubr.bf16.vlgmr.msra.gmra.mrb[0].mxu0 %v1603_v18  ;;  %1468 = vmatpush3.bf16.msra.mxu1 %v1633_v38 }
  0xa8   : > { %616 = vmatprep.mubr.bf16.mxu0 %v1606_v19  ;;  %1469 = vmatprep.subr.bf16.mxu1 %v1634_v39 }
  0xa9   : > { %998 = vmatpush1.bf16.msra.mxu0 %v2262_v40 }
  0xaa   : > { %999 = vmatprep.subr.bf16.mxu0 %v2264_v42 }
  0xab   : > { %1470 = vmatpush3.bf16.msra.mxu1 %v1634_v39 }
  0xac   : > { %1487 = vmatprep.subr.bf16.mxu1 %v1637_v41 }
  0xad   : > { %1000 = vmatpush1.bf16.msra.mxu0 %v2267_v43 }
  0xae   : > { %1001 = vmatprep.subr.bf16.mxu0 %v2270_v44 }
  0xaf   : > { %617 = vmatmul.mubr.bf16.gmra.mrb[4].mxu0 %v1608_v20 }
  0xb0   : > { %624 = vmatprep.mubr.bf16.mxu0 %v1609_v21 }
  0xb1   : > { %1002 = vmatpush1.bf16.msra.mxu0 %v2273_v45 }
  0xb2   : > { %1003 = vmatprep.subr.bf16.mxu0 %v2276_v46 }
  0xb5   : > { %1004 = vmatpush1.bf16.msra.mxu0 %v2279_v47 }
  0xb7   : > { %625 = vmatmul.mubr.bf16.gmra.mrb[8].mxu0 %v1611_v22 }
  0xb8   : > { %632 = vmatprep.mubr.bf16.mxu0 %v1612_v23 }
  0xbf   : > { %633 = vmatmul.mubr.bf16.gmra.mrb[12].mxu0 %v1614_v24 }
  0xc0   : > { %640 = vmatprep.mubr.bf16.mxu0 %v1615_v25 }
  0xc7   : > { %641 = vmatmul.mubr.bf16.gmra.mrb[16].mxu0 %v1617_v26 }
  0xc8   : > { %648 = vmatprep.mubr.bf16.mxu0 %v1618_v27 }
  0xcf   : > { %649 = vmatmul.mubr.bf16.gmra.mrb[20].mxu0 %v1620_v28 }
  0xd0   : > { %656 = vmatprep.mubr.bf16.mxu0 %v1621_v29 }
  0xd7   : > { %657 = vmatmul.mubr.bf16.gmra.mrb[24].mxu0 %v1623_v30 }
  0xd8   : > { %664 = vmatprep.mubr.bf16.mxu0 %v1624_v31 }
  0xdf   : > { %665 = vmatmul.mubr.bf16.gmra.mrb[28].mxu0 %v1626_v32 }
 0x17a   : > { %v1391_v48 = vpop.f32.mrb[0].mxu0 }
 0x17b   : > { %v1392_v50 = vpop.f32.mrb[1].mxu0 }
 0x17c   : > { %v1393_v51 = vadd.f32 %v1392_v50, %v1391_v48  ;;  %v1394_v52 = vpop.f32.mrb[2].mxu0 }
 0x17d   : > { %v1395_v53 = vpop.f32.mrb[3].mxu0 }
 0x17e   : > { %v611_v54 = vadd.f32 %v1393_v51, %v2286_v49  ;;  %v1396_v55 = vadd.f32 %v1395_v53, %v1394_v52 }
 0x180   : > { %v614_v56 = vadd.f32 %v1396_v55, %v2286_v49  ;;  %1659 = vtanh.f32 %v611_v54 }
 0x182   : > { %1661 = vtanh.f32 %v614_v56  ;;  %v1397_v57 = vpop.f32.mrb[4].mxu0 }
 0x183   : > { %v1398_v58 = vpop.f32.mrb[5].mxu0 }
 0x184   : > { %v1399_v59 = vadd.f32 %v1398_v58, %v1397_v57  ;;  %v1400_v60 = vpop.f32.mrb[6].mxu0 }
 0x185   : > { %v1401_v61 = vpop.f32.mrb[7].mxu0 }
 0x186   : > { %v619_v62 = vadd.f32 %v1399_v59, %v2286_v49  ;;  %v1402_v63 = vadd.f32 %v1401_v61, %v1400_v60 }
 0x188   : > { %v622_v0 = vadd.f32 %v1402_v63, %v2286_v49  ;;  %1663 = vtanh.f32 %v619_v62 }
 0x18a   : > { %1665 = vtanh.f32 %v622_v0  ;;  %v1403_v1 = vpop.f32.mrb[8].mxu0  ;;  %v1660_v2 = vpop.eup %1659 }
 0x18b   : > { %v1404_v3 = vpop.f32.mrb[9].mxu0 }
 0x18c   : > { %v1662_v4 = vpop.eup %1661  ;;  %v1405_v5 = vadd.f32 %v1404_v3, %v1403_v1  ;;  %v1406_v6 = vpop.f32.mrb[10].mxu0 }
 0x18d   : > { %v1407_v7 = vpop.f32.mrb[11].mxu0  ;;  %v689_v8 = vpack.c.bf16 %v1662_v4, %v1660_v2 }
 0x18e   : > { %v627_v9 = vadd.f32 %v1405_v5, %v2286_v49  ;;  %v1408_v10 = vadd.f32 %v1407_v7, %v1406_v6 }
 0x18f   : > { %1471 = vmatprep.mubr.bf16.mxu1 %v689_v8 }
 0x190   : > { %v630_v11 = vadd.f32 %v1408_v10, %v2286_v49  ;;  %1667 = vtanh.f32 %v627_v9  ;;  %v1649_v10 = vld [vmem:[#allocation8 + $0x44] ss:$8 sps:$4 sm:$0xff]  }
 0x191   : > { %1005 = vmatprep.subr.bf16.mxu0 %v1649_v10 }
 0x192   : > { %1669 = vtanh.f32 %v630_v11  ;;  %v1409_v12 = vpop.f32.mrb[12].mxu0  ;;  %v1664_v13 = vpop.eup %1663  ;;  %v1647_v11 = vld [vmem:[#allocation8 + $0x40] ss:$8 sps:$4 sm:$0xff]  }
 0x193   : > { %v1410_v14 = vpop.f32.mrb[13].mxu0  ;;  %1006 = vmatpush1.bf16.msra.mxu0 %v1647_v11 }
 0x194   : > { %v1666_v15 = vpop.eup %1665  ;;  %v1411_v16 = vadd.f32 %v1410_v14, %v1409_v12  ;;  %v1412_v17 = vpop.f32.mrb[14].mxu0  ;;  %v1652_v12 = vld [vmem:[#allocation8 + $0x54] ss:$8 sps:$4 sm:$0xff]   ;;  %v1655_v14 = vld [vmem:[#allocation8 + $0x64] ss:$8 sps:$4 sm:$0xff]  }
 0x195   : > { %v1413_v18 = vpop.f32.mrb[15].mxu0  ;;  %v690_v19 = vpack.c.bf16 %v1666_v15, %v1664_v13  ;;  %v1650_v13 = vld [vmem:[#allocation8 + $0x50] ss:$8 sps:$4 sm:$0xff]   ;;  %1007 = vmatprep.subr.bf16.mxu0 %v1652_v12  ;;  %v1658_v15 = vld [vmem:[#allocation8 + $0x74] ss:$8 sps:$4 sm:$0xff]  }
 0x196   : > { %v635_v20 = vadd.f32 %v1411_v16, %v2286_v49  ;;  %v1414_v21 = vadd.f32 %v1413_v18, %v1412_v17  ;;  %v1656_v16 = vld [vmem:[#allocation8 + $0x70] ss:$8 sps:$4 sm:$0xff]   ;;  %v1985_v17 = vmov 0   ;;  %v2316_v18 = vld [vmem:[%s2469_s4] ss:$0 sm:$0xff] }
 0x197   : > { %1472 = vmatmul.mubr.bf16.vlgmr.msra.gmra.mrb[0].mxu1 %v690_v19  ;;  %1008 = vmatpush1.bf16.msra.mxu0 %v1650_v13 }
 0x198   : > { %v638_v22 = vadd.f32 %v1414_v21, %v2286_v49  ;;  %1495 = vmatpush1.bf16.msra.mxu1 %v2262_v40  ;;  %1671 = vtanh.f32 %v635_v20  ;;  %1009 = vmatprep.subr.bf16.mxu0 %v1655_v14 }
 0x199   : > { %1488 = vmatprep.subr.bf16.mxu1 %v2264_v42  ;;  %1029 = vmatprep.mubr.bf16.mxu0 %v1985_v17 }
 0x19a   : > { %1673 = vtanh.f32 %v638_v22  ;;  %v1415_v23 = vpop.f32.mrb[16].mxu0  ;;  %v1668_v24 = vpop.eup %1667 }
 0x19b   : > { %v1416_v25 = vpop.f32.mrb[17].mxu0 }
 0x19c   : > { %v1670_v26 = vpop.eup %1669  ;;  %v1417_v27 = vadd.f32 %v1416_v25, %v1415_v23  ;;  %v1418_v28 = vpop.f32.mrb[18].mxu0  ;;  %1496 = vmatpush1.bf16.msra.mxu1 %v2267_v43 }
 0x19d   : > { %v1419_v29 = vpop.f32.mrb[19].mxu0  ;;  %v691_v30 = vpack.c.bf16 %v1670_v26, %v1668_v24  ;;  %1489 = vmatprep.subr.bf16.mxu1 %v2270_v44 }
 0x19e   : > { %v643_v31 = vadd.f32 %v1417_v27, %v2286_v49  ;;  %v1420_v32 = vadd.f32 %v1419_v29, %v1418_v28 }
 0x19f   : > { %1475 = vmatprep.mubr.bf16.mxu1 %v691_v30 }
 0x1a0   : > { %v646_v33 = vadd.f32 %v1420_v32, %v2286_v49  ;;  %1497 = vmatpush1.bf16.msra.mxu1 %v2273_v45  ;;  %1675 = vtanh.f32 %v643_v31 }
 0x1a1   : > { %1490 = vmatprep.subr.bf16.mxu1 %v2276_v46 }
 0x1a2   : > { %1677 = vtanh.f32 %v646_v33  ;;  %v1421_v34 = vpop.f32.mrb[20].mxu0  ;;  %v1672_v35 = vpop.eup %1671 }
 0x1a3   : > { %v1422_v36 = vpop.f32.mrb[21].mxu0 }
 0x1a4   : > { %v1674_v37 = vpop.eup %1673  ;;  %v1423_v38 = vadd.f32 %v1422_v36, %v1421_v34  ;;  %v1424_v39 = vpop.f32.mrb[22].mxu0  ;;  %1498 = vmatpush1.bf16.msra.mxu1 %v2279_v47 }
 0x1a5   : > { %v1425_v40 = vpop.f32.mrb[23].mxu0  ;;  %v692_v41 = vpack.c.bf16 %v1674_v37, %v1672_v35  ;;  %1491 = vmatprep.subr.bf16.mxu1 %v1649_v10 }
 0x1a6   : > { %v651_v42 = vadd.f32 %v1423_v38, %v2286_v49  ;;  %v1426_v43 = vadd.f32 %v1425_v40, %v1424_v39 }
 0x1a7   : > { %1476 = vmatmul.mubr.bf16.gmra.mrb[4].mxu1 %v692_v41 }
 0x1a8   : > { %v654_v44 = vadd.f32 %v1426_v43, %v2286_v49  ;;  %1679 = vtanh.f32 %v651_v42  ;;  %1499 = vmatpush1.bf16.msra.mxu1 %v1647_v11 }
 0x1a9   : > { %1492 = vmatprep.subr.bf16.mxu1 %v1652_v12  ;;  %v907_v12 = vlaneseq }
 0x1aa   : > { %1681 = vtanh.f32 %v654_v44  ;;  %v1427_v45 = vpop.f32.mrb[24].mxu0  ;;  %v1676_v46 = vpop.eup %1675 }
 0x1ab   : > { %v1428_v48 = vpop.f32.mrb[25].mxu0 }
 0x1ac   : > { %v1678_v50 = vpop.eup %1677  ;;  %v1429_v51 = vadd.f32 %v1428_v48, %v1427_v45  ;;  %v1430_v52 = vpop.f32.mrb[26].mxu0  ;;  %1500 = vmatpush1.bf16.msra.mxu1 %v1650_v13  ;;  %v908_v13 = vshrl.u32 %v907_v12, 7 }
 0x1ad   : > { %v1431_v53 = vpop.f32.mrb[27].mxu0  ;;  %v693_v54 = vpack.c.bf16 %v1678_v50, %v1676_v46  ;;  %1493 = vmatprep.subr.bf16.mxu1 %v1655_v14 }
 0x1ae   : > { %v659_v47 = vadd.f32 %v1429_v51, %v2286_v49  ;;  %v1432_v55 = vadd.f32 %v1431_v53, %v1430_v52  ;;  %v909_v14 = vsub.s32 0, %v908_v13 }
 0x1af   : > { %1479 = vmatprep.mubr.bf16.mxu1 %v693_v54 }
 0x1b0   : > { %v662_v56 = vadd.f32 %v1432_v55, %v2286_v49  ;;  %1683 = vtanh.f32 %v659_v47 }
 0x1b2   : > { %1685 = vtanh.f32 %v662_v56  ;;  %v1433_v57 = vpop.f32.mrb[28].mxu0  ;;  %v1680_v58 = vpop.eup %1679 }
 0x1b3   : > { %v1434_v59 = vpop.f32.mrb[29].mxu0 }
 0x1b4   : > { %v1682_v60 = vpop.eup %1681  ;;  %v1435_v61 = vadd.f32 %v1434_v59, %v1433_v57  ;;  %v1436_v62 = vpop.f32.mrb[30].mxu0 }
 0x1b5   : > { %v1437_v63 = vpop.f32.mrb[31].mxu0  ;;  %v694_v0 = vpack.c.bf16 %v1682_v60, %v1680_v58 }
 0x1b6   : > { %v667_v1 = vadd.f32 %v1435_v61, %v2286_v49  ;;  %v1438_v2 = vadd.f32 %v1437_v63, %v1436_v62 }
 0x1b7   : > { %1480 = vmatmul.mubr.bf16.gmra.mrb[8].mxu1 %v694_v0 }
 0x1b8   : > { %v670_v3 = vadd.f32 %v1438_v2, %v2286_v49  ;;  %1687 = vtanh.f32 %v667_v1  ;;  %v1653_v49 = vld [vmem:[#allocation8 + $0x60] ss:$8 sps:$4 sm:$0xff]  }
 0x1b9   : > { %1010 = vmatpush1.bf16.msra.mxu0 %v1653_v49  ;;  %1501 = vmatpush1.bf16.msra.mxu1 %v1653_v49  ;;  %v905_v49 = vld [vmem:[%s2471_s6] sm:$0x3] }
 0x1ba   : > { %1689 = vtanh.f32 %v670_v3  ;;  %v1684_v4 = vpop.eup %1683  ;;  %1011 = vmatprep.subr.bf16.mxu0 %v1658_v15  ;;  %1494 = vmatprep.subr.bf16.mxu1 %v1658_v15  ;;  %v913_v15 = vsub.s32 1, %v908_v13 }
 0x1bc   : > { %v1686_v5 = vpop.eup %1685 }
 0x1bd   : > { %v695_v6 = vpack.c.bf16 %v1686_v5, %v1684_v4  ;;  %1012 = vmatpush1.bf16.msra.mxu0 %v1656_v16  ;;  %1502 = vmatpush1.bf16.msra.mxu1 %v1656_v16  ;;  %v2343_v16 = vrot.slane %v905_v49, %v909_v14 }
 0x1bf   : > { %1483 = vmatprep.mubr.bf16.mxu1 %v695_v6 }
 0x1c2   : > { %v1688_v7 = vpop.eup %1687 }
 0x1c4   : > { %v1690_v8 = vpop.eup %1689 }
 0x1c5   : > { %v696_v9 = vpack.c.bf16 %v1690_v8, %v1688_v7 }
 0x1c7   : > { %1484 = vmatmul.mubr.bf16.gmra.mrb[12].mxu1 %v696_v9 }
 0x1c8   : > { %1049 = vmatprep.mubr.bf16.mxu1 %v1985_v17 }
 0x26a   : > { %v1473_v19 = vpop.f32.mrb[0].mxu1 }
 0x26b   : > { %v811_v20 = vadd.f32 %v1473_v19, %v2316_v18  ;;  %v802_v21 = vpop.f32.mrb[1].mxu1 }
 0x26c   : > { %v803_v22 = vadd.f32 %v2316_v18, %v802_v21  ;;  %v1474_v23 = vpop.f32.mrb[2].mxu1 }
 0x26d   : > { %1691 = vtanh.f32 %v811_v20  ;;  %v814_v24 = vadd.f32 %v1474_v23, %v2316_v18  ;;  %v805_v25 = vpop.f32.mrb[3].mxu1 }
 0x26e   : > { %1693 = vtanh.f32 %v803_v22  ;;  %v806_v26 = vadd.f32 %v2316_v18, %v805_v25 }
 0x26f   : > { %1695 = vtanh.f32 %v814_v24 }
 0x270   : > { %1697 = vtanh.f32 %v806_v26 }
 0x277   : > { %v1692_v27 = vpop.eup %1691 }
 0x278   : > { %v1694_v28 = vpop.eup %1693 }
 0x279   : > { %v1696_v29 = vpop.eup %1695 }
 0x27a   : > { %v1698_v30 = vpop.eup %1697  ;;  %v1477_v31 = vpop.f32.mrb[4].mxu1  ;;  %v882_v32 = vpack.c.bf16 %v1696_v29, %v1692_v27 }
 0x27b   : > { %v827_v33 = vadd.f32 %v1477_v31, %v2316_v18  ;;  %v818_v34 = vpop.f32.mrb[5].mxu1  ;;  %v881_v35 = vpack.c.bf16 %v1698_v30, %v1694_v28 }
 0x27c   : > { %v819_v36 = vadd.f32 %v2316_v18, %v818_v34  ;;  %v1478_v37 = vpop.f32.mrb[6].mxu1 }
 0x27d   : > { %1699 = vtanh.f32 %v827_v33  ;;  %v830_v38 = vadd.f32 %v1478_v37, %v2316_v18  ;;  %v821_v39 = vpop.f32.mrb[7].mxu1  ;;  %1030 = vmatmul.mubr.bf16.vlgmr.msra.gmra.mrb[32].mxu0 %v881_v35 }
 0x27e   : > { %1701 = vtanh.f32 %v819_v36  ;;  %v822_v40 = vadd.f32 %v2316_v18, %v821_v39  ;;  %1039 = vmatprep.mubr.bf16.mxu0 %v1985_v17 }
 0x27f   : > { %1703 = vtanh.f32 %v830_v38 }
 0x280   : > { %1705 = vtanh.f32 %v822_v40 }
 0x285   : > { %1040 = vmatmul.mubr.bf16.gmra.mrb[36].mxu0 %v882_v32 }
 0x287   : > { %v1700_v41 = vpop.eup %1699 }
 0x288   : > { %v1702_v42 = vpop.eup %1701 }
 0x289   : > { %v1704_v43 = vpop.eup %1703 }
 0x28a   : > { %v1706_v44 = vpop.eup %1705  ;;  %v1481_v45 = vpop.f32.mrb[8].mxu1  ;;  %v884_v46 = vpack.c.bf16 %v1704_v43, %v1700_v41 }
 0x28b   : > { %v843_v48 = vadd.f32 %v1481_v45, %v2316_v18  ;;  %v834_v50 = vpop.f32.mrb[9].mxu1  ;;  %v883_v51 = vpack.c.bf16 %v1706_v44, %v1702_v42 }
 0x28c   : > { %v835_v52 = vadd.f32 %v2316_v18, %v834_v50  ;;  %v1482_v53 = vpop.f32.mrb[10].mxu1 }
 0x28d   : > { %1707 = vtanh.f32 %v843_v48  ;;  %v846_v54 = vadd.f32 %v1482_v53, %v2316_v18  ;;  %v837_v47 = vpop.f32.mrb[11].mxu1  ;;  %1050 = vmatmul.mubr.bf16.vlgmr.msra.gmra.mrb[16].mxu1 %v883_v51 }
 0x28e   : > { %1709 = vtanh.f32 %v835_v52  ;;  %v838_v55 = vadd.f32 %v2316_v18, %v837_v47  ;;  %1059 = vmatprep.mubr.bf16.mxu1 %v1985_v17 }
 0x28f   : > { %1711 = vtanh.f32 %v846_v54 }
 0x290   : > { %1713 = vtanh.f32 %v838_v55 }
 0x295   : > { %1060 = vmatmul.mubr.bf16.gmra.mrb[20].mxu1 %v884_v46 }
 0x296   : > { %1069 = vmatprep.mubr.bf16.mxu1 %v1985_v17 }
 0x297   : > { %v1708_v56 = vpop.eup %1707 }
 0x298   : > { %v1710_v57 = vpop.eup %1709 }
 0x299   : > { %v1712_v58 = vpop.eup %1711 }
 0x29a   : > { %v1714_v59 = vpop.eup %1713  ;;  %v1485_v60 = vpop.f32.mrb[12].mxu1  ;;  %v886_v61 = vpack.c.bf16 %v1712_v58, %v1708_v56 }
 0x29b   : > { %v859_v62 = vadd.f32 %v1485_v60, %v2316_v18  ;;  %v850_v63 = vpop.f32.mrb[13].mxu1  ;;  %v885_v0 = vpack.c.bf16 %v1714_v59, %v1710_v57 }
 0x29c   : > { %v851_v1 = vadd.f32 %v2316_v18, %v850_v63  ;;  %v1486_v2 = vpop.f32.mrb[14].mxu1 }
 0x29d   : > { %1715 = vtanh.f32 %v859_v62  ;;  %v862_v3 = vadd.f32 %v1486_v2, %v2316_v18  ;;  %v853_v4 = vpop.f32.mrb[15].mxu1  ;;  %1070 = vmatmul.mubr.bf16.gmra.mrb[24].mxu1 %v885_v0 }
 0x29e   : > { %1717 = vtanh.f32 %v851_v1  ;;  %v854_v5 = vadd.f32 %v2316_v18, %v853_v4  ;;  %1079 = vmatprep.mubr.bf16.mxu1 %v1985_v17  ;;  %v2345_v18 = vrot.slane %v905_v49, %v913_v15 }
 0x29f   : > { %1719 = vtanh.f32 %v862_v3 }
 0x2a0   : > { %1721 = vtanh.f32 %v854_v5 }
 0x2a5   : > { %1080 = vmatmul.mubr.bf16.gmra.mrb[28].mxu1 %v886_v61 }
 0x2a6   : > { %1089 = vmatprep.mubr.bf16.mxu1 %v1985_v17 }
 0x2a7   : > { %v1716_v6 = vpop.eup %1715 }
 0x2a8   : > { %v1718_v7 = vpop.eup %1717 }
 0x2a9   : > { %v1720_v8 = vpop.eup %1719 }
 0x2aa   : > { %v1722_v9 = vpop.eup %1721  ;;  %v888_v10 = vpack.c.bf16 %v1720_v8, %v1716_v6 }
 0x2ab   : > { %v887_v11 = vpack.c.bf16 %v1722_v9, %v1718_v7 }
 0x2ad   : > { %1090 = vmatmul.mubr.bf16.gmra.mrb[32].mxu1 %v887_v11 }
 0x2ae   : > { %1099 = vmatprep.mubr.bf16.mxu1 %v1985_v17 }
 0x2b5   : > { %1100 = vmatmul.mubr.bf16.gmra.mrb[36].mxu1 %v888_v10 }
 0x350   : > { %v1031_v19 = vpop.f32.mrb[32].mxu0 }
 0x351   : > { %v1032_v20 = vadd.f32 %v1031_v19, %v2343_v16  ;;  %v1033_v21 = vpop.f32.mrb[33].mxu0 }
 0x352   : > { %v1034_v17 = vadd.f32 %v1033_v21, %v2345_v18  ;;  %v1035_v22 = vpop.f32.mrb[34].mxu0 }
 0x353   : > { %1723 = vtanh.f32 %v1032_v20  ;;  %v1036_v23 = vadd.f32 %v1035_v22, %v2343_v16  ;;  %v1037_v24 = vpop.f32.mrb[35].mxu0 }
 0x354   : > { %1725 = vtanh.f32 %v1034_v17  ;;  %v1038_v25 = vadd.f32 %v1037_v24, %v2345_v18 }
 0x355   : > { %1727 = vtanh.f32 %v1036_v23 }
 0x356   : > { %1729 = vtanh.f32 %v1038_v25 }
 0x358   : > { %v1041_v26 = vpop.f32.mrb[36].mxu0 }
 0x359   : > { %v1042_v27 = vadd.f32 %v1041_v26, %v2343_v16  ;;  %v1043_v28 = vpop.f32.mrb[37].mxu0 }
 0x35a   : > { %v1044_v29 = vadd.f32 %v1043_v28, %v2345_v18  ;;  %v1045_v30 = vpop.f32.mrb[38].mxu0 }
 0x35b   : > { %1731 = vtanh.f32 %v1042_v27  ;;  %v1046_v31 = vadd.f32 %v1045_v30, %v2343_v16  ;;  %v1047_v32 = vpop.f32.mrb[39].mxu0 }
 0x35c   : > { %1733 = vtanh.f32 %v1044_v29  ;;  %v1048_v33 = vadd.f32 %v1047_v32, %v2345_v18 }
 0x35d   : > { %v1724_v34 = vpop.eup %1723  ;;  %1735 = vtanh.f32 %v1046_v31 }
 0x35e   : > { %v1726_v35 = vpop.eup %1725  ;;  %1142 = vst [vmem:[%s2356_s17] sm:$0xff] %v1724_v34  ;;  %1737 = vtanh.f32 %v1048_v33 }
 0x35f   : > { %v1728_v36 = vpop.eup %1727  ;;  %1143 = vst [vmem:[%s2356_s17 + $0x8] sm:$0xff] %v1726_v35 }
 0x360   : > { %v1730_v37 = vpop.eup %1729  ;;  %1144 = vst [vmem:[%s2356_s17 + $0x10] sm:$0xff] %v1728_v36  ;;  %v1051_v38 = vpop.f32.mrb[16].mxu1 }
 0x361   : > { %1145 = vst [vmem:[%s2356_s17 + $0x18] sm:$0xff] %v1730_v37  ;;  %v1052_v39 = vadd.f32 %v1051_v38, %v2343_v16  ;;  %v1053_v40 = vpop.f32.mrb[17].mxu1 }
 0x362   : > { %v1054_v41 = vadd.f32 %v1053_v40, %v2345_v18  ;;  %v1055_v42 = vpop.f32.mrb[18].mxu1 }
 0x363   : > { %1739 = vtanh.f32 %v1052_v39  ;;  %v1056_v43 = vadd.f32 %v1055_v42, %v2343_v16  ;;  %v1057_v44 = vpop.f32.mrb[19].mxu1 }
 0x364   : > { %1741 = vtanh.f32 %v1054_v41  ;;  %v1058_v45 = vadd.f32 %v1057_v44, %v2345_v18 }
 0x365   : > { %v1732_v46 = vpop.eup %1731  ;;  %1743 = vtanh.f32 %v1056_v43 }
 0x366   : > { %v1734_v48 = vpop.eup %1733  ;;  %1146 = vst [vmem:[%s2356_s17 + $0x20] sm:$0xff] %v1732_v46  ;;  %1745 = vtanh.f32 %v1058_v45 }
 0x367   : > { %v1736_v50 = vpop.eup %1735  ;;  %1147 = vst [vmem:[%s2356_s17 + $0x28] sm:$0xff] %v1734_v48 }
 0x368   : > { %v1738_v51 = vpop.eup %1737  ;;  %1148 = vst [vmem:[%s2356_s17 + $0x30] sm:$0xff] %v1736_v50  ;;  %v1061_v52 = vpop.f32.mrb[20].mxu1 }
 0x369   : > { %1149 = vst [vmem:[%s2356_s17 + $0x38] sm:$0xff] %v1738_v51  ;;  %v1062_v53 = vadd.f32 %v1061_v52, %v2343_v16  ;;  %v1063_v54 = vpop.f32.mrb[21].mxu1 }
 0x36a   : > { %v1064_v47 = vadd.f32 %v1063_v54, %v2345_v18  ;;  %v1065_v55 = vpop.f32.mrb[22].mxu1 }
 0x36b   : > { %1747 = vtanh.f32 %v1062_v53  ;;  %v1066_v56 = vadd.f32 %v1065_v55, %v2343_v16  ;;  %v1067_v57 = vpop.f32.mrb[23].mxu1 }
 0x36c   : > { %1749 = vtanh.f32 %v1064_v47  ;;  %v1068_v58 = vadd.f32 %v1067_v57, %v2345_v18 }
 0x36d   : > { %v1740_v59 = vpop.eup %1739  ;;  %1751 = vtanh.f32 %v1066_v56 }
 0x36e   : > { %v1742_v60 = vpop.eup %1741  ;;  %1150 = vst [vmem:[%s2356_s17 + $0x40] sm:$0xff] %v1740_v59  ;;  %1753 = vtanh.f32 %v1068_v58 }
 0x36f   : > { %v1744_v61 = vpop.eup %1743  ;;  %1151 = vst [vmem:[%s2356_s17 + $0x48] sm:$0xff] %v1742_v60 }
 0x370   : > { %v1746_v62 = vpop.eup %1745  ;;  %1152 = vst [vmem:[%s2356_s17 + $0x50] sm:$0xff] %v1744_v61  ;;  %v1071_v63 = vpop.f32.mrb[24].mxu1 }
 0x371   : > { %1153 = vst [vmem:[%s2356_s17 + $0x58] sm:$0xff] %v1746_v62  ;;  %v1072_v0 = vadd.f32 %v1071_v63, %v2343_v16  ;;  %v1073_v1 = vpop.f32.mrb[25].mxu1 }
 0x372   : > { %v1074_v2 = vadd.f32 %v1073_v1, %v2345_v18  ;;  %v1075_v3 = vpop.f32.mrb[26].mxu1 }
 0x373   : > { %1755 = vtanh.f32 %v1072_v0  ;;  %v1076_v4 = vadd.f32 %v1075_v3, %v2343_v16  ;;  %v1077_v5 = vpop.f32.mrb[27].mxu1 }
 0x374   : > { %1757 = vtanh.f32 %v1074_v2  ;;  %v1078_v6 = vadd.f32 %v1077_v5, %v2345_v18 }
 0x375   : > { %v1748_v7 = vpop.eup %1747  ;;  %1759 = vtanh.f32 %v1076_v4 }
 0x376   : > { %v1750_v8 = vpop.eup %1749  ;;  %1154 = vst [vmem:[%s2356_s17 + $0x60] sm:$0xff] %v1748_v7  ;;  %1761 = vtanh.f32 %v1078_v6 }
 0x377   : > { %v1752_v9 = vpop.eup %1751  ;;  %1155 = vst [vmem:[%s2356_s17 + $0x68] sm:$0xff] %v1750_v8 }
 0x378   : > { %v1754_v10 = vpop.eup %1753  ;;  %1156 = vst [vmem:[%s2356_s17 + $0x70] sm:$0xff] %v1752_v9  ;;  %v1081_v11 = vpop.f32.mrb[28].mxu1 }
 0x379   : > { %1157 = vst [vmem:[%s2356_s17 + $0x78] sm:$0xff] %v1754_v10  ;;  %v1082_v12 = vadd.f32 %v1081_v11, %v2343_v16  ;;  %v1083_v13 = vpop.f32.mrb[29].mxu1 }
 0x37a   : > { %v1084_v14 = vadd.f32 %v1083_v13, %v2345_v18  ;;  %v1085_v49 = vpop.f32.mrb[30].mxu1 }
 0x37b   : > { %1763 = vtanh.f32 %v1082_v12  ;;  %v1086_v15 = vadd.f32 %v1085_v49, %v2343_v16  ;;  %v1087_v19 = vpop.f32.mrb[31].mxu1 }
 0x37c   : > { %1765 = vtanh.f32 %v1084_v14  ;;  %v1088_v20 = vadd.f32 %v1087_v19, %v2345_v18 }
 0x37d   : > { %v1756_v21 = vpop.eup %1755  ;;  %1767 = vtanh.f32 %v1086_v15 }
 0x37e   : > { %v1758_v17 = vpop.eup %1757  ;;  %1158 = vst [vmem:[%s2356_s17 + $0x80] sm:$0xff] %v1756_v21  ;;  %1769 = vtanh.f32 %v1088_v20 }
 0x37f   : > { %v1760_v22 = vpop.eup %1759  ;;  %1159 = vst [vmem:[%s2356_s17 + $0x88] sm:$0xff] %v1758_v17 }
 0x380   : > { %v1762_v23 = vpop.eup %1761  ;;  %1160 = vst [vmem:[%s2356_s17 + $0x90] sm:$0xff] %v1760_v22  ;;  %v1091_v24 = vpop.f32.mrb[32].mxu1 }
 0x381   : > { %1161 = vst [vmem:[%s2356_s17 + $0x98] sm:$0xff] %v1762_v23  ;;  %v1092_v25 = vadd.f32 %v1091_v24, %v2343_v16  ;;  %v1093_v26 = vpop.f32.mrb[33].mxu1 }
 0x382   : > { %v1094_v27 = vadd.f32 %v1093_v26, %v2345_v18  ;;  %v1095_v28 = vpop.f32.mrb[34].mxu1 }
 0x383   : > { %1771 = vtanh.f32 %v1092_v25  ;;  %v1096_v29 = vadd.f32 %v1095_v28, %v2343_v16  ;;  %v1097_v30 = vpop.f32.mrb[35].mxu1 }
 0x384   : > { %1773 = vtanh.f32 %v1094_v27  ;;  %v1098_v31 = vadd.f32 %v1097_v30, %v2345_v18 }
 0x385   : > { %v1764_v32 = vpop.eup %1763  ;;  %1775 = vtanh.f32 %v1096_v29 }
 0x386   : > { %v1766_v33 = vpop.eup %1765  ;;  %1162 = vst [vmem:[%s2356_s17 + $0xa0] sm:$0xff] %v1764_v32  ;;  %1777 = vtanh.f32 %v1098_v31 }
 0x387   : > { %v1768_v34 = vpop.eup %1767  ;;  %1163 = vst [vmem:[%s2356_s17 + $0xa8] sm:$0xff] %v1766_v33 }
 0x388   : > { %v1770_v35 = vpop.eup %1769  ;;  %1164 = vst [vmem:[%s2356_s17 + $0xb0] sm:$0xff] %v1768_v34  ;;  %v1101_v36 = vpop.f32.mrb[36].mxu1 }
 0x389   : > { %1165 = vst [vmem:[%s2356_s17 + $0xb8] sm:$0xff] %v1770_v35  ;;  %v1102_v37 = vadd.f32 %v1101_v36, %v2343_v16  ;;  %v1103_v38 = vpop.f32.mrb[37].mxu1 }
 0x38a   : > { %v1104_v39 = vadd.f32 %v1103_v38, %v2345_v18  ;;  %v1105_v40 = vpop.f32.mrb[38].mxu1 }
 0x38b   : > { %1779 = vtanh.f32 %v1102_v37  ;;  %v1106_v41 = vadd.f32 %v1105_v40, %v2343_v16  ;;  %v1107_v42 = vpop.f32.mrb[39].mxu1 }
 0x38c   : > { %1781 = vtanh.f32 %v1104_v39  ;;  %v1108_v43 = vadd.f32 %v1107_v42, %v2345_v18 }
 0x38d   : > { %v1772_v44 = vpop.eup %1771  ;;  %1783 = vtanh.f32 %v1106_v41 }
 0x38e   : > { %v1774_v45 = vpop.eup %1773  ;;  %1166 = vst [vmem:[%s2356_s17 + $0xc0] sm:$0xff] %v1772_v44  ;;  %1785 = vtanh.f32 %v1108_v43 }
 0x38f   : > { %v1776_v46 = vpop.eup %1775  ;;  %1167 = vst [vmem:[%s2356_s17 + $0xc8] sm:$0xff] %v1774_v45 }
 0x390   : > { %v1778_v48 = vpop.eup %1777  ;;  %1168 = vst [vmem:[%s2356_s17 + $0xd0] sm:$0xff] %v1776_v46 }
 0x391   : > { %1169 = vst [vmem:[%s2356_s17 + $0xd8] sm:$0xff] %v1778_v48 }
 0x395   : > { %v1780_v16 = vpop.eup %1779 }
 0x396   : > { %v1782_v50 = vpop.eup %1781  ;;  %1170 = vst [vmem:[%s2356_s17 + $0xe0] sm:$0xff] %v1780_v16 }
 0x397   : > { %v1784_v18 = vpop.eup %1783  ;;  %1171 = vst [vmem:[%s2356_s17 + $0xe8] sm:$0xff] %v1782_v50 }
 0x398   : > { %v1786_v51 = vpop.eup %1785  ;;  %1172 = vst [vmem:[%s2356_s17 + $0xf0] sm:$0xff] %v1784_v18 }
 0x399   : > { %1173 = vst [vmem:[%s2356_s17 + $0xf8] sm:$0xff] %v1786_v51 }
 0x39a   : > { %1914 = shalt.err (!%p1911_p4)
}
 0x39b   : > { %s1915_s22 = scalar_lea.hbm %s2416_s11, 4096  ;;  %s1919_s15 = scalar_lea.hbm %s2472_s7, 8192 }
 0x39c   : > { %p1916_p9 = scmp.ne.s32.totalorder %s2416_s11, %s1915_s22  ;;  %p1920_p8 = scmp.lt.u32.totalorder %s2416_s11, %s2472_s7 }
 0x39d   : > { %p1921_p13 = scmp.lt.u32.totalorder %s1919_s15, %s1915_s22  ;;  %p1923_p10 = scmp.lt.u32.totalorder %s1915_s22, %s2416_s11 }
 0x39e   : > { %p1917_p0 = pnand %p1916_p9, %p2177_p5 }
 0x39f   : > { %p1922_p6 = por %p1921_p13, %p1920_p8 }
 0x3a0   : > { %p1918_p11 = pneg %p1917_p0 }
 0x3a1   : > { %p1924_p3 = por %p1923_p10, %p1922_p6 }
 0x3a3   : > { %p1925_p7 = pnand %p1924_p3, %p1918_p11 }
 0x3a5   : > { %1928 = shalt.err (!%p1925_p7)
}
 0x3a6   : > { %s1987_s29 = smov 256   ;;  %s1988_s23 = smov 16  }
 0x3a7   : > { %1517 = dma.vmem_to_hbm [thread:$0]  (%p2177_p5), %s2418_s16, 4096, %s2416_s11, %s1175_s28, %s1987_s29, %s1987_s29, %s1988_s23  }
 0x3a8 PF: > { %s2492_s20 = sld [smem:[#allocation15_spill]]  ;;  %s1204_s30 = sand.u32 1, %s1963_s24  }
 0x3a9   : > { %p2494_p2 = scmp.ge.s32.totalorder %s1975_s27, 2  ;;  %s1205_s9 = scalar_lea.sflag [#allocation4], %s1204_s30 }
 0x3ae   : > { %p2493_p12 = scmp.ne.s32.totalorder %s2492_s20, 0 }
 0x3b0   : > { %p1534_p1 = pnand %p2494_p2, %p2493_p12 }
 0x3b2   : > { %1958 = dma.done.wait (!%p1534_p1), %s1205_s9, 4096  }
 0x3b3   : > { %1960 = vsyncadd (!%p1534_p1), %s1205_s9, 4294963200  ;;  %p22_p4 = scmp.ge.s32.totalorder %s2163_s8, 4   ;;  %s2495_s24 = smov %s1967_s25 }
 0x3b4   : > { %s2496_s25 = smov %s1971_s26  ;;  %s2497_s26 = smov %s2173_s19 }
 0x3b5   : > { %s2498_s27 = smov %s2163_s8  ;;  %24 = sbr.rel (!%p22_p4) target bundleno = 7 (0x7), region = 105 }
 0x3bc   :  { %1210 = vsyncpa [#allocation3], 1 }
 0x3bd   :  { %1212 = vsyncpa [#allocation3 + $0x1], 1 }
 0x3be   :  { %1213 = vsyncpa [#allocation6], 1 }
 0x3bf   :  { %1214 = vsyncpa [#allocation9], 1 }
 0x3c0   :  { %1215 = vsyncpa [#allocation4], 1 }
 0x3c1   :  { %1217 = vsyncpa [#allocation4 + $0x1], 1 }

</bundles_post_ra>
